<compile_context>
chip_gen: v7x
topology: tpu7x:2x2x1
jax: 0.10.0
libtpu: 0.0.40
codegen_flags: <defaults>
</compile_context>

<pallas_src>
import jax
import jax.numpy as jnp
from jax.experimental import pallas as pl
from jax.experimental.pallas import tpu as pltpu


# ---------------------------------------------------------------------------
# Kernel
# ---------------------------------------------------------------------------
def _bgr_to_hsv_kernel(x_ref, o_ref):
    # x_ref / o_ref: (3, tile_h, tile_w) float32 in VMEM, channels = B, G, R
    b = x_ref[0, :, :]
    g = x_ref[1, :, :]
    r = x_ref[2, :, :]

    v = jnp.maximum(jnp.maximum(b, g), r)
    mn = jnp.minimum(jnp.minimum(b, g), r)
    diff = v - mn

    # Saturation: (V - min) / V, 0 when V <= 0.  One exact reciprocal.
    v_pos = v > 0.0
    inv_v = 1.0 / jnp.where(v_pos, v, 1.0)
    s = jnp.where(v_pos, diff * inv_v, 0.0)

    # Hue: offset + 60 * numerator / diff, with cv2's v==r / v==g tie-breaking.
    d_pos = diff > 0.0
    inv_d = 1.0 / jnp.where(d_pos, diff, 1.0)        # exact (not approx) reciprocal

    is_r = v == r
    is_g = jnp.logical_and(jnp.logical_not(is_r), v == g)
    num = jnp.where(is_r, g - b, jnp.where(is_g, b - r, r - g))
    off = jnp.where(is_r, 0.0, jnp.where(is_g, 120.0, 240.0))

    h = off + 60.0 * (num * inv_d)
    h = jnp.where(d_pos, h, 0.0)                     # gray pixels -> H = 0
    h = jnp.where(h < 0.0, h + 360.0, h)             # wrap negative hues

    o_ref[0, :, :] = h
    o_ref[1, :, :] = s
    o_ref[2, :, :] = v


# ---------------------------------------------------------------------------
# Tiling helpers
# ---------------------------------------------------------------------------
def _round_up(x: int, m: int) -> int:
    return ((x + m - 1) // m) * m


def _pick_tiles(hp: int, wp: int, max_block_bytes: int):
    """Pick (tile_h, tile_w): lane-dense, a few MiB per block, >=2 grid steps."""
    tile_w = min(wp, 2048)                              # multiple of 128 (wp is)
    rows = max_block_bytes // (3 * tile_w * 4)          # rows fitting the budget
    tile_h = min(hp, max(8, (rows // 8) * 8))           # multiple of 8
    # Keep at least 2 grid steps when possible so both v7x TensorCores get work.
    if (pl.cdiv(hp, tile_h) * pl.cdiv(wp, tile_w)) < 2 and tile_h > 8:
        tile_h = max(8, _round_up(tile_h // 2, 8))
    return tile_h, tile_w


# ---------------------------------------------------------------------------
# Planar (transpose-free) entry point: (3, H, W) BGR -> (3, H, W) HSV
# ---------------------------------------------------------------------------
def bgr_to_hsv_planar(x_chw_bgr: jax.Array, *, max_block_bytes: int = 6 << 20) -> jax.Array:
    assert x_chw_bgr.ndim == 3 and x_chw_bgr.shape[0] == 3
    _, H, W = x_chw_bgr.shape
    x = x_chw_bgr.astype(jnp.float32)

    # Pad to the (8, 128) layout grain; pl.cdiv handles any remaining raggedness
    # (edge blocks are masked on TPU), so arbitrary H/W are supported.
    hp = _round_up(H, 8)
    wp = _round_up(W, 128)
    if (hp, wp) != (H, W):
        x = jnp.pad(x, ((0, 0), (0, hp - H), (0, wp - W)))

    tile_h, tile_w = _pick_tiles(hp, wp, max_block_bytes)
    grid = (pl.cdiv(hp, tile_h), pl.cdiv(wp, tile_w))

    block_bytes = 3 * tile_h * tile_w * 4
    # double-buffered input + output (~4x one block) plus headroom
    vmem_limit = min(max(4 * block_bytes + (8 << 20), 32 << 20), 100 << 20)

    out = pl.pallas_call(
        _bgr_to_hsv_kernel,
        out_shape=jax.ShapeDtypeStruct((3, hp, wp), jnp.float32),
        grid_spec=pltpu.PrefetchScalarGridSpec(
            num_scalar_prefetch=0,
            grid=grid,
            in_specs=[pl.BlockSpec((3, tile_h, tile_w), lambda i, j: (0, i, j))],
            out_specs=pl.BlockSpec((3, tile_h, tile_w), lambda i, j: (0, i, j)),
        ),
        compiler_params=pltpu.CompilerParams(
            dimension_semantics=("parallel", "parallel"),
            vmem_limit_bytes=vmem_limit,
        ),
    )(x)

    if (hp, wp) != (H, W):
        out = out[:, :H, :W]
    return out


# ---------------------------------------------------------------------------
# cv2-compatible entry point: (H, W, 3) BGR -> (H, W, 3) HSV
# ---------------------------------------------------------------------------
def color_to_hsv(sample_hwc_bgr: jax.Array, **kwargs) -> jax.Array:
    """BGR (H, W, 3) float32 image -> HSV (H, W, 3) float32 (cv2 float semantics).

    Note: the HWC<->planar transposes below are pure layout plumbing and cost
    two extra HBM round-trips; pipelines that can keep image data planar should
    call bgr_to_hsv_planar() directly to stay transpose-free end-to-end.
    """
    assert sample_hwc_bgr.ndim == 3 and sample_hwc_bgr.shape[-1] == 3
    x_chw = jnp.transpose(sample_hwc_bgr, (2, 0, 1))
    out_chw = bgr_to_hsv_planar(x_chw, **kwargs)
    return jnp.transpose(out_chw, (1, 2, 0))


# ---------------------------------------------------------------------------
# Pure-JAX reference (cv2 float BGR->HSV formula) for sanity checking
# ---------------------------------------------------------------------------
def _hsv_reference(x_hwc_bgr):
    b, g, r = x_hwc_bgr[..., 0], x_hwc_bgr[..., 1], x_hwc_bgr[..., 2]
    v = jnp.maximum(jnp.maximum(b, g), r)
    mn = jnp.minimum(jnp.minimum(b, g), r)
    diff = v - mn
    s = jnp.where(v > 0, diff / jnp.where(v > 0, v, 1.0), 0.0)
    safe = jnp.where(diff > 0, diff, 1.0)
    h = jnp.where(v == r, 60.0 * (g - b) / safe,
                  jnp.where(v == g, 120.0 + 60.0 * (b - r) / safe,
                            240.0 + 60.0 * (r - g) / safe))
    h = jnp.where(diff > 0, h, 0.0)
    h = jnp.where(h < 0, h + 360.0, h)
    return jnp.stack([h, s, v], axis=-1)


if __name__ == "__main__":
    key = jax.random.PRNGKey(0)

    # Small deterministic BGR float32 images in [0, 1], HWC like cv2 expects.
    # Second case is deliberately non-(8,128)-aligned to exercise the padding
    # / ragged-grid path (old version asserted divisibility instead).
    cases = [(32, 256), (20, 200)]
    for idx, (H, W) in enumerate(cases):
        k = jax.random.fold_in(key, idx)
        sample = jax.random.uniform(k, (H, W, 3), dtype=jnp.float32)

        hsv = color_to_hsv(sample)
        jax.block_until_ready(hsv)

        ref = _hsv_reference(sample)
        assert hsv.shape == sample.shape and hsv.dtype == jnp.float32
        assert jnp.allclose(hsv, ref, atol=1e-4, rtol=1e-4), f"HWC mismatch at {(H, W)}"

        # Transpose-free planar path must agree as well.
        hsv_planar = bgr_to_hsv_planar(jnp.transpose(sample, (2, 0, 1)))
        jax.block_until_ready(hsv_planar)
        assert jnp.allclose(jnp.transpose(hsv_planar, (1, 2, 0)), ref,
                            atol=1e-4, rtol=1e-4), f"planar mismatch at {(H, W)}"

    print("KERNEL_OK")
</pallas_src>

<mosaic_0001>
module attributes {stable_mosaic.version = 11 : i64} {
  func.func @_bgr_to_hsv_kernel(%arg0: i32, %arg1: i32, %arg2: memref<3x16x256xf32, #tpu.memory_space<vmem>>, %arg3: memref<3x16x256xf32, #tpu.memory_space<vmem>>) attributes {dimension_semantics = [#tpu.dimension_semantics<parallel>, #tpu.dimension_semantics<parallel>], iteration_bounds = array<i64: 2, 1>, scalar_prefetch = 0 : i64, scratch_operands = 0 : i64, tpu.core_type = #tpu.core_type<tc>, window_params = [{transform_indices = @transform_0, window_bounds = array<i64: 3, 16, 256>}, {transform_indices = @transform_1, window_bounds = array<i64: 3, 16, 256>}]} {
    %c0 = arith.constant 0 : index
    %c0_0 = arith.constant 0 : index
    %c0_1 = arith.constant 0 : index
    %0 = vector.load %arg2[%c0, %c0_0, %c0_1] : memref<3x16x256xf32, #tpu.memory_space<vmem>>, vector<1x16x256xf32>
    %1 = vector.shape_cast %0 : vector<1x16x256xf32> to vector<16x256xf32>
    %c1 = arith.constant 1 : index
    %c0_2 = arith.constant 0 : index
    %c0_3 = arith.constant 0 : index
    %2 = vector.load %arg2[%c1, %c0_2, %c0_3] : memref<3x16x256xf32, #tpu.memory_space<vmem>>, vector<1x16x256xf32>
    %3 = vector.shape_cast %2 : vector<1x16x256xf32> to vector<16x256xf32>
    %c2 = arith.constant 2 : index
    %c0_4 = arith.constant 0 : index
    %c0_5 = arith.constant 0 : index
    %4 = vector.load %arg2[%c2, %c0_4, %c0_5] : memref<3x16x256xf32, #tpu.memory_space<vmem>>, vector<1x16x256xf32>
    %5 = vector.shape_cast %4 : vector<1x16x256xf32> to vector<16x256xf32>
    %6 = arith.maximumf %1, %3 : vector<16x256xf32>
    %7 = arith.maximumf %6, %5 : vector<16x256xf32>
    %8 = arith.minimumf %1, %3 : vector<16x256xf32>
    %9 = arith.minimumf %8, %5 : vector<16x256xf32>
    %10 = arith.subf %7, %9 : vector<16x256xf32>
    %cst = arith.constant 0.000000e+00 : f32
    %11 = vector.broadcast %cst : f32 to vector<16x256xf32>
    %12 = arith.cmpf ogt, %7, %11 : vector<16x256xf32>
    %cst_6 = arith.constant 1.000000e+00 : f32
    %13 = vector.broadcast %cst_6 : f32 to vector<16x256xf32>
    %14 = arith.select %12, %7, %13 : vector<16x256xi1>, vector<16x256xf32>
    %cst_7 = arith.constant 1.000000e+00 : f32
    %15 = vector.broadcast %cst_7 : f32 to vector<16x256xf32>
    %16 = arith.divf %15, %14 : vector<16x256xf32>
    %17 = arith.mulf %10, %16 : vector<16x256xf32>
    %cst_8 = arith.constant 0.000000e+00 : f32
    %18 = vector.broadcast %cst_8 : f32 to vector<16x256xf32>
    %19 = arith.select %12, %17, %18 : vector<16x256xi1>, vector<16x256xf32>
    %cst_9 = arith.constant 0.000000e+00 : f32
    %20 = vector.broadcast %cst_9 : f32 to vector<16x256xf32>
    %21 = arith.cmpf ogt, %10, %20 : vector<16x256xf32>
    %cst_10 = arith.constant 1.000000e+00 : f32
    %22 = vector.broadcast %cst_10 : f32 to vector<16x256xf32>
    %23 = arith.select %21, %10, %22 : vector<16x256xi1>, vector<16x256xf32>
    %cst_11 = arith.constant 1.000000e+00 : f32
    %24 = vector.broadcast %cst_11 : f32 to vector<16x256xf32>
    %25 = arith.divf %24, %23 : vector<16x256xf32>
    %26 = arith.cmpf oeq, %7, %5 : vector<16x256xf32>
    %cst_12 = arith.constant dense<true> : vector<16x256xi1>
    %27 = arith.xori %26, %cst_12 : vector<16x256xi1>
    %28 = arith.cmpf oeq, %7, %3 : vector<16x256xf32>
    %29 = arith.andi %27, %28 : vector<16x256xi1>
    %30 = arith.subf %3, %1 : vector<16x256xf32>
    %31 = arith.subf %1, %5 : vector<16x256xf32>
    %32 = arith.subf %5, %3 : vector<16x256xf32>
    %33 = arith.select %29, %31, %32 : vector<16x256xi1>, vector<16x256xf32>
    %34 = arith.select %26, %30, %33 : vector<16x256xi1>, vector<16x256xf32>
    %cst_13 = arith.constant 1.200000e+02 : f32
    %cst_14 = arith.constant 2.400000e+02 : f32
    %35 = vector.broadcast %cst_13 : f32 to vector<16x256xf32>
    %36 = vector.broadcast %cst_14 : f32 to vector<16x256xf32>
    %37 = arith.select %29, %35, %36 : vector<16x256xi1>, vector<16x256xf32>
    %cst_15 = arith.constant 0.000000e+00 : f32
    %38 = vector.broadcast %cst_15 : f32 to vector<16x256xf32>
    %39 = arith.select %26, %38, %37 : vector<16x256xi1>, vector<16x256xf32>
    %40 = arith.mulf %34, %25 : vector<16x256xf32>
    %cst_16 = arith.constant 6.000000e+01 : f32
    %41 = vector.broadcast %cst_16 : f32 to vector<16x256xf32>
    %42 = arith.mulf %41, %40 : vector<16x256xf32>
    %43 = arith.addf %39, %42 : vector<16x256xf32>
    %cst_17 = arith.constant 0.000000e+00 : f32
    %44 = vector.broadcast %cst_17 : f32 to vector<16x256xf32>
    %45 = arith.select %21, %43, %44 : vector<16x256xi1>, vector<16x256xf32>
    %cst_18 = arith.constant 0.000000e+00 : f32
    %46 = vector.broadcast %cst_18 : f32 to vector<16x256xf32>
    %47 = arith.cmpf olt, %45, %46 : vector<16x256xf32>
    %cst_19 = arith.constant 3.600000e+02 : f32
    %48 = vector.broadcast %cst_19 : f32 to vector<16x256xf32>
    %49 = arith.addf %45, %48 : vector<16x256xf32>
    %50 = arith.select %47, %49, %45 : vector<16x256xi1>, vector<16x256xf32>
    %c0_20 = arith.constant 0 : index
    %c0_21 = arith.constant 0 : index
    %c0_22 = arith.constant 0 : index
    %51 = vector.load %arg3[%c0_20, %c0_21, %c0_22] : memref<3x16x256xf32, #tpu.memory_space<vmem>>, vector<1x16x256xf32>
    %52 = vector.shape_cast %51 : vector<1x16x256xf32> to vector<16x256xf32>
    %53 = vector.shape_cast %50 : vector<16x256xf32> to vector<1x16x256xf32>
    tpu.vector_store %arg3[%c0_20, %c0_21, %c0_22], %53 {strides = array<i32>} : memref<3x16x256xf32, #tpu.memory_space<vmem>>, vector<1x16x256xf32>,
    %c1_23 = arith.constant 1 : index
    %c0_24 = arith.constant 0 : index
    %c0_25 = arith.constant 0 : index
    %54 = vector.load %arg3[%c1_23, %c0_24, %c0_25] : memref<3x16x256xf32, #tpu.memory_space<vmem>>, vector<1x16x256xf32>
    %55 = vector.shape_cast %54 : vector<1x16x256xf32> to vector<16x256xf32>
    %56 = vector.shape_cast %19 : vector<16x256xf32> to vector<1x16x256xf32>
    tpu.vector_store %arg3[%c1_23, %c0_24, %c0_25], %56 {strides = array<i32>} : memref<3x16x256xf32, #tpu.memory_space<vmem>>, vector<1x16x256xf32>,
    %c2_26 = arith.constant 2 : index
    %c0_27 = arith.constant 0 : index
    %c0_28 = arith.constant 0 : index
    %57 = vector.load %arg3[%c2_26, %c0_27, %c0_28] : memref<3x16x256xf32, #tpu.memory_space<vmem>>, vector<1x16x256xf32>
    %58 = vector.shape_cast %57 : vector<1x16x256xf32> to vector<16x256xf32>
    %59 = vector.shape_cast %7 : vector<16x256xf32> to vector<1x16x256xf32>
    tpu.vector_store %arg3[%c2_26, %c0_27, %c0_28], %59 {strides = array<i32>} : memref<3x16x256xf32, #tpu.memory_space<vmem>>, vector<1x16x256xf32>,
    return
  }
  func.func @transform_0(%arg0: i32, %arg1: i32) -> (i32, i32, i32) {
    %c0_i32 = arith.constant 0 : i32
    %c0_i32_0 = arith.constant 0 : i32
    return %c0_i32, %arg0, %arg1 : i32, i32, i32
  }
  func.func @transform_1(%arg0: i32, %arg1: i32) -> (i32, i32, i32) {
    %c0_i32 = arith.constant 0 : i32
    %c0_i32_0 = arith.constant 0 : i32
    return %c0_i32, %arg0, %arg1 : i32, i32, i32
  }
}

</mosaic_0001>

<bundles_post_ra>
// kernel: tpu_custom_call.1
= control target key start
LH: loop header
LB: loop body
LE: loop exit
PB: predicated region body
PF: predicated region fallthrough
CT: control target
= control target key end

     0   :  { %6 = vsyncpa [#allocation3], 0  ;;  %s1103_s0 = inlined_call_operand.hbm [shape: f32[3,32,256], index: 0, kind: input, shape index: {}]   ;;  %s1104_s1 = inlined_call_operand.hbm [shape: f32[3,32,256], index: 1, kind: output, shape index: {}]  }
   0x1   :  { %8 = vsyncpa [#allocation3 + $0x1], 0 }
   0x2   :  { %9 = vsyncpa [#allocation4], 0 }
   0x3   :  { %11 = vsyncpa [#allocation4 + $0x1], 0  ;;  %s695_s6 = smov 0   ;;  %s697_s7 = smov 0  }
   0x4   :  { %s699_s8 = smov 0   ;;  %s701_s9 = smov 0  }
   0x5   :  { %s703_s10 = smov 0   ;;  %s705_s11 = smov 0  }
   0x6 LB: > { %s476_s12 = sadd.s32 4294967295, %s668_s11   ;;  %s477_s13 = sadd.s32 4294967294, %s668_s11   ;;  %s668_s11 = sphi %s705_s11, %s17_s11   ;;  %s664_s10 = sphi %s703_s10, %s1121_s10   ;;  %s660_s9 = sphi %s701_s9, %s1120_s9   ;;  %s656_s8 = sphi %s699_s8, %s1119_s8   ;;  %s652_s7 = sphi %s697_s7, %s1118_s7   ;;  %s648_s6 = sphi %s695_s6, %s1117_s6  }
   0x7   : > { %s29_s14 = sadd.s32 1, %s664_s10  ;;  %s38_s15 = sadd.s32 1, %s656_s8 }
   0x8   : > { %p31_p0 = scmp.ge.s32.totalorder %s29_s14, 2  ;;  %p45_p1 = scmp.ne.s32.totalorder %s656_s8, %s652_s7 }
   0x9   : > { %p46_p2 = scmp.eq.s32.totalorder %s668_s11, 0  ;;  %p51_p3 = scmp.ne.s32.totalorder %s652_s7, %s648_s6 }
   0xa   : > { %s1123_s14 = smov (%p31_p0, %s29_s14), 0  ;;  %p52_p5 = scmp.eq.s32.totalorder %s476_s12, 0 }
   0xb   : > { %p736_p4 = por %p46_p2, %p45_p1  ;;  %s33_s17 = ssub.s32 %s664_s10, %s1123_s14 }
   0xc   : > { %p77_p6 = scmp.eq.s32.totalorder %s476_s12, 1  ;;  %p36_p7 = scmp.eq.s32.totalorder %s33_s17, 0 }
   0xd   : > { %p742_p8 = por %p52_p5, %p51_p3  ;;  %p83_p10 = scmp.eq.s32.totalorder %s477_s13, 1 }
   0xe   : > { %p746_p9 = por %p77_p6, %p45_p1  ;;  %p479_p12 = scmp.ge.s32.totalorder %s668_s11, 2 }
   0xf   : > { %s751_s20 = scalar_select %p36_p7, %s656_s8, %s38_s15  }
  0x10   : > { %p753_p11 = por %p83_p10, %p51_p3  ;;  %99 = sbr.rel (%p479_p12) target bundleno = 37 (0x25), region = 16 }
  0x17   : > { %s103_s22 = sand.u32 1, %s656_s8   ;;  %s508_s24 = sshll.u32 %s664_s10, 9 }
  0x18   : > { %s511_s23 = smul.u32 96, %s103_s22  ;;  %s670_s25 = smov 1024  }
  0x19   : > { %514 = sst [smem:[#allocation7]] (%p736_p4), %s670_s25  ;;  %s116_s29 = scalar_lea.hbm %s1103_s0, %s508_s24 }
  0x1a   : > { %s513_s26 = scalar_select %p736_p4, [#allocation0], [#allocation10] }
  0x1b   : > { %s107_s2 = scalar_lea.vmem [#allocation2], %s511_s23  ;;  %s671_s4 = smov 512  }
  0x1c   : > { %s121_s30 = sld [smem:[%s513_s26]]   ;;  %s129_s3 = sshll.u32 %s107_s2, 4  ;;  %s130_s3 = int_to_ptr.vmem [resolvable:$true] %s129_s3 }
  0x1d   : > { %515 = sst [smem:[#allocation7 + $0x1]] (%p736_p4), %s671_s4  ;;  %s672_s5 = smov 2  }
  0x1e   : > { %516 = sst [smem:[#allocation7 + $0x2]] (%p736_p4), %s672_s5  ;;  %s673_s12 = smov 256  }
  0x1f   : > { %517 = sst [smem:[#allocation7 + $0x3]] (%p736_p4), %s673_s12  ;;  %s674_s13 = smov 16  }
  0x20   : > { %518 = sst [smem:[#allocation7 + $0x4]] (%p736_p4), %s673_s12  ;;  %s104_s23 = scalar_lea.sflag [#allocation3], %s103_s22 }
  0x21   : > { %519 = sst [smem:[#allocation7 + $0x5]] (%p736_p4), %s674_s13  ;;  %s675_s24 = smov [#allocation6]  }
  0x22   : > { %s483_s15 = sshll.u32 %s121_s30, 26 }
  0x23   : > { %s484_s17 = sadd.s32 134217728, %s483_s15 }
  0x24   : > { %520 = dma.general (%p736_p4), %s116_s29, 1536, %s130_s3, %s104_s23, %s675_s24, [#allocation7], %s484_s17, 0  }
  0x25 PF: > { %p485_p13 = scmp.ge.s32.totalorder %s668_s11, 1  ;;  %p150_p0 = scmp.lt.s32.totalorder %s668_s11, 3 }
  0x27   : > { %p151_p1 = pnand %p485_p13, %p150_p0 }
  0x28   : > { %s784_s25 = sand.u32 (!%p151_p1), 1, %s652_s7  }
  0x29   : > { %154 = sbr.rel (%p151_p1) target bundleno = 99 (0x63), region = 24  ;;  %s157_s27 = scalar_lea.sflag (!%p151_p1), [#allocation3], %s784_s25 }
  0x2a   : > { %s512_s26 = smul.u32 (!%p151_p1), 96, %s784_s25 }
  0x2c   : > { %s788_s28 = scalar_lea.vmem (!%p151_p1), [#allocation2], %s512_s26 }
  0x30   : > { %639 = dma.done.wait (%p742_p8), %s157_s27, 1536  }
  0x31   : > { %641 = vsyncadd (%p742_p8), %s157_s27, 4294965760  ;;  %v795_v0 = vld [vmem:[%s788_s28] sm:$0xff]  ;;  %v808_v5 = vld [vmem:[%s788_s28 + $0x8] sm:$0xff]  ;;  %s846_s16 = scalar_lea.vmem [#allocation5], %s512_s26  ;;  %vm676_vm3 = vmmov 1   ;;  %v677_v45 = vmov 240.0  }
  0x32   : > { %v798_v1 = vld [vmem:[%s788_s28 + $0x20] sm:$0xff]  ;;  %v811_v6 = vld [vmem:[%s788_s28 + $0x28] sm:$0xff]  ;;  %v821_v10 = vld [vmem:[%s788_s28 + $0x10] sm:$0xff]  ;;  %s344_s18 = scalar_lea.sflag [#allocation4], %s784_s25 }
  0x33   : > { %v801_v2 = vld [vmem:[%s788_s28 + $0x40] sm:$0xff]  ;;  %v197_v3 = vmax.f32 %v795_v0, %v798_v1  ;;  %v205_v4 = vmin.f32 %v795_v0, %v798_v1  ;;  %v814_v7 = vld [vmem:[%s788_s28 + $0x48] sm:$0xff]  ;;  %v198_v8 = vmax.f32 %v808_v5, %v811_v6  ;;  %v206_v9 = vmin.f32 %v808_v5, %v811_v6  ;;  %v824_v11 = vld [vmem:[%s788_s28 + $0x30] sm:$0xff] }
  0x34   : > { %v831_v14 = vld [vmem:[%s788_s28 + $0x50] sm:$0xff]  ;;  %v199_v17 = vmax.f32 %v821_v10, %v824_v11  ;;  %v207_v18 = vmin.f32 %v821_v10, %v824_v11  ;;  %v277_v24 = vsub.f32 %v795_v0, %v801_v2  ;;  %v281_v25 = vsub.f32 %v801_v2, %v798_v1  ;;  %v888_v27 = vld [vmem:[%s788_s28 + $0x18] sm:$0xff] }
  0x35   : > { %v827_v12 = vmax.f32 %v197_v3, %v801_v2  ;;  %v209_v13 = vmin.f32 %v205_v4, %v801_v2  ;;  %v834_v15 = vmax.f32 %v198_v8, %v814_v7  ;;  %v210_v16 = vmin.f32 %v206_v9, %v814_v7  ;;  %v891_v28 = vld [vmem:[%s788_s28 + $0x38] sm:$0xff] }
  0x36   : > { %v858_v21 = vmax.f32 %v199_v17, %v831_v14  ;;  %v211_v22 = vmin.f32 %v207_v18, %v831_v14  ;;  %v273_v30 = vsub.f32 %v798_v1, %v795_v0  ;;  %v274_v32 = vsub.f32 %v811_v6, %v808_v5  ;;  %v911_v35 = vld [vmem:[%s788_s28 + $0x58] sm:$0xff] }
  0x37   : > { %v842_v19 = vsub.f32 %v827_v12, %v209_v13  ;;  %vm257_vm0 = vcmp.eq.f32.partialorder %v827_v12, %v801_v2  ;;  %498 = vst [vmem:[%s846_s16 + $0x40] sm:$0xff] %v827_v12  ;;  %v851_v20 = vsub.f32 %v834_v15, %v210_v16  ;;  %vm258_vm1 = vcmp.eq.f32.partialorder %v834_v15, %v814_v7 }
  0x38   : > { %499 = vst [vmem:[%s846_s16 + $0x48] sm:$0xff] %v834_v15  ;;  %vm261_vm4 = vmxor %vm257_vm0, %vm676_vm3  ;;  %vm265_vm5 = vcmp.eq.f32.partialorder %v827_v12, %v798_v1  ;;  %vm266_vm8 = vcmp.eq.f32.partialorder %v834_v15, %v811_v6  ;;  %v900_v31 = vsub.f32 %v858_v21, %v211_v22  ;;  %v278_v33 = vsub.f32 %v808_v5, %v814_v7 }
  0x39   : > { %vm241_vm2 = vcmp.gt.f32.partialorder %v842_v19, 0.0  ;;  %vm242_vm6 = vcmp.gt.f32.partialorder %v851_v20, 0.0  ;;  %500 = vst [vmem:[%s846_s16 + $0x50] sm:$0xff] %v858_v21  ;;  %vm262_vm7 = vmxor %vm258_vm1, %vm676_vm3  ;;  %v282_v34 = vsub.f32 %v814_v7, %v811_v6  ;;  %vm259_vm10 = vcmp.eq.f32.partialorder %v858_v21, %v831_v14 }
  0x3a   : > { %v245_v23 = vsel %vm241_vm2, %v842_v19, 1.0  ;;  %v246_v26 = vsel %vm242_vm6, %v851_v20, 1.0  ;;  %vm893_vm9 = vmand %vm261_vm4, %vm265_vm5  ;;  %vm243_vm12 = vcmp.gt.f32.partialorder %v900_v31, 0.0  ;;  %v275_v37 = vsub.f32 %v824_v11, %v821_v10 }
  0x3b   : > { %598 = vrcp.f32 %v245_v23  ;;  %vm913_vm11 = vmand %vm262_vm7, %vm266_vm8  ;;  %v200_v38 = vmax.f32 %v888_v27, %v891_v28  ;;  %v208_v39 = vmin.f32 %v888_v27, %v891_v28  ;;  %v285_v40 = vsel %vm893_vm9, %v277_v24, %v281_v25 }
  0x3c   : > { %600 = vrcp.f32 %v246_v26  ;;  %v247_v41 = vsel %vm243_vm12, %v900_v31, 1.0  ;;  %vm263_vm13 = vmxor %vm259_vm10, %vm676_vm3  ;;  %vm267_vm14 = vcmp.eq.f32.partialorder %v858_v21, %v824_v11  ;;  %vm217_vm15 = vcmp.gt.f32.partialorder %v827_v12, 0.0 }
  0x3d   : > { %602 = vrcp.f32 %v247_v41  ;;  %v279_v42 = vsub.f32 %v821_v10, %v831_v14  ;;  %v283_v43 = vsub.f32 %v831_v14, %v824_v11  ;;  %v941_v44 = vmax.f32 %v200_v38, %v911_v35  ;;  %vm955_vm4 = vmand %vm263_vm13, %vm267_vm14 }
  0x3e   : > { %v293_v46 = vsel %vm893_vm9, 120.0, %v677_v45  ;;  %v286_v47 = vsel %vm913_vm11, %v278_v33, %v282_v34  ;;  %v212_v48 = vmin.f32 %v208_v39, %v911_v35  ;;  %v221_v49 = vsel %vm217_vm15, %v827_v12, 1.0 }
  0x3f   : > { %v289_v50 = vsel %vm257_vm0, %v273_v30, %v285_v40  ;;  %vm260_vm5 = vcmp.eq.f32.partialorder %v941_v44, %v911_v35  ;;  %501 = vst [vmem:[%s846_s16 + $0x58] sm:$0xff] %v941_v44  ;;  %604 = vrcp.f32 %v221_v49  ;;  %vm218_vm7 = vcmp.gt.f32.partialorder %v834_v15, 0.0 }
  0x40   : > { %v965_v52 = vsub.f32 %v941_v44, %v212_v48  ;;  %v222_v53 = vsel %vm218_vm7, %v834_v15, 1.0  ;;  %vm219_vm8 = vcmp.gt.f32.partialorder %v858_v21, 0.0  ;;  %vm220_vm9 = vcmp.gt.f32.partialorder %v941_v44, 0.0 }
  0x41   : > { %v290_v54 = vsel %vm258_vm1, %v274_v32, %v286_v47  ;;  %v294_v55 = vsel %vm913_vm11, 120.0, %v677_v45  ;;  %606 = vrcp.f32 %v222_v53  ;;  %v223_v56 = vsel %vm219_vm8, %v858_v21, 1.0  ;;  %vm264_vm11 = vmxor %vm260_vm5, %vm676_vm3 }
  0x42   : > { %v287_v58 = vsel %vm955_vm4, %v279_v42, %v283_v43  ;;  %vm244_vm13 = vcmp.gt.f32.partialorder %v965_v52, 0.0  ;;  %608 = vrcp.f32 %v223_v56  ;;  %v224_v59 = vsel %vm220_vm9, %v941_v44, 1.0 }
  0x43   : > { %v297_v61 = vsel %vm257_vm0, 0.0, %v293_v46  ;;  %v248_v63 = vsel %vm244_vm13, %v965_v52, 1.0  ;;  %vm268_vm14 = vcmp.eq.f32.partialorder %v941_v44, %v891_v28  ;;  %v298_v0 = vsel %vm258_vm1, 0.0, %v294_v55 }
  0x44   : > { %610 = vrcp.f32 %v248_v63  ;;  %v280_v2 = vsub.f32 %v888_v27, %v911_v35  ;;  %v291_v4 = vsel %vm259_vm10, %v275_v37, %v287_v58  ;;  %v284_v5 = vsub.f32 %v911_v35, %v891_v28  ;;  %vm1012_vm0 = vmand %vm264_vm11, %vm268_vm14 }
  0x45   : > { %v599_v57 = vpop.eup %598  ;;  %612 = vrcp.f32 %v224_v59  ;;  %v295_v7 = vsel %vm955_vm4, 120.0, %v677_v45  ;;  %v276_v16 = vsub.f32 %v891_v28, %v888_v27  ;;  %v296_v37 = vsel %vm1012_vm0, 120.0, %v677_v45 }
  0x46   : > { %v601_v60 = vpop.eup %600  ;;  %v301_v62 = vmul.f32 %v599_v57, %v289_v50  ;;  %v299_v22 = vsel %vm259_vm10, 0.0, %v295_v7  ;;  %v288_v23 = vsel %vm1012_vm0, %v280_v2, %v284_v5 }
  0x47   : > { %v302_v1 = vmul.f32 %v601_v60, %v290_v54  ;;  %v603_v9 = vpop.eup %602  ;;  %v292_v33 = vsel %vm260_vm5, %v276_v16, %v288_v23 }
  0x48   : > { %v305_v3 = vmul.f32 60.0, %v301_v62  ;;  %v303_v13 = vmul.f32 %v603_v9, %v291_v4 }
  0x49   : > { %v306_v6 = vmul.f32 60.0, %v302_v1  ;;  %v605_v17 = vpop.eup %604 }
  0x4a   : > { %v309_v10 = vadd.f32 %v305_v3, %v297_v61  ;;  %v307_v26 = vmul.f32 60.0, %v303_v13  ;;  %v233_v29 = vmul.f32 %v605_v17, %v842_v19 }
  0x4b   : > { %v310_v11 = vadd.f32 %v306_v6, %v298_v0  ;;  %v607_v27 = vpop.eup %606 }
  0x4c   : > { %v313_v18 = vsel %vm241_vm2, %v309_v10, 0.0  ;;  %v609_v30 = vpop.eup %608  ;;  %v311_v32 = vadd.f32 %v307_v26, %v299_v22  ;;  %v234_v34 = vmul.f32 %v607_v27, %v851_v20  ;;  %v237_v19 = vsel %vm217_vm15, %v233_v29, 0.0 }
  0x4d   : > { %vm317_vm1 = vcmp.lt.f32.partialorder %v313_v18, 0.0  ;;  %v321_v24 = vadd.f32 360.0, %v313_v18  ;;  %v314_v25 = vsel %vm242_vm6, %v310_v11, 0.0  ;;  %v235_v38 = vmul.f32 %v609_v30, %v900_v31  ;;  %494 = vst [vmem:[%s846_s16 + $0x20] sm:$0xff] %v237_v19 }
  0x4e   : > { %vm318_vm3 = vcmp.lt.f32.partialorder %v314_v25, 0.0  ;;  %v322_v28 = vadd.f32 360.0, %v314_v25  ;;  %v611_v39 = vpop.eup %610  ;;  %v315_v40 = vsel %vm243_vm12, %v311_v32, 0.0  ;;  %v238_v20 = vsel %vm218_vm7, %v234_v34, 0.0 }
  0x4f   : > { %v325_v14 = vsel %vm317_vm1, %v321_v24, %v313_v18  ;;  %v613_v41 = vpop.eup %612  ;;  %vm319_vm2 = vcmp.lt.f32.partialorder %v315_v40, 0.0  ;;  %v323_v42 = vadd.f32 360.0, %v315_v40  ;;  %v304_v43 = vmul.f32 %v611_v39, %v292_v33  ;;  %495 = vst [vmem:[%s846_s16 + $0x28] sm:$0xff] %v238_v20 }
  0x50   : > { %329 = vst [vmem:[%s846_s16] sm:$0xff] %v325_v14  ;;  %v326_v36 = vsel %vm318_vm3, %v322_v28, %v314_v25  ;;  %v239_v12 = vsel %vm219_vm8, %v235_v38, 0.0  ;;  %v300_v31 = vsel %vm260_vm5, 0.0, %v296_v37  ;;  %v236_v45 = vmul.f32 %v613_v41, %v965_v52 }
  0x51   : > { %330 = vst [vmem:[%s846_s16 + $0x8] sm:$0xff] %v326_v36  ;;  %496 = vst [vmem:[%s846_s16 + $0x30] sm:$0xff] %v239_v12  ;;  %v327_v15 = vsel %vm319_vm2, %v323_v42, %v315_v40  ;;  %v308_v46 = vmul.f32 60.0, %v304_v43 }
  0x52   : > { %331 = vst [vmem:[%s846_s16 + $0x10] sm:$0xff] %v327_v15  ;;  %v240_v47 = vsel %vm220_vm9, %v236_v45, 0.0 }
  0x53   : > { %v312_v48 = vadd.f32 %v308_v46, %v300_v31  ;;  %497 = vst [vmem:[%s846_s16 + $0x38] sm:$0xff] %v240_v47 }
  0x55   : > { %v316_v21 = vsel %vm244_vm13, %v312_v48, 0.0 }
  0x56   : > { %vm320_vm6 = vcmp.lt.f32.partialorder %v316_v21, 0.0  ;;  %v324_v49 = vadd.f32 360.0, %v316_v21 }
  0x58   : > { %v328_v50 = vsel %vm320_vm6, %v324_v49, %v316_v21 }
  0x59   : > { %332 = vst [vmem:[%s846_s16 + $0x18] sm:$0xff] %v328_v50 }
  0x5a   : > { %s510_s22 = sshll.u32 %s660_s9, 9  ;;  %s376_s29 = sshll.u32 %s846_s16, 4  ;;  %s377_s29 = int_to_ptr.vmem [resolvable:$true] %s376_s29 }
  0x5b   : > { %s359_s3 = scalar_lea.hbm %s1104_s1, %s510_s22  ;;  %s678_s4 = smov 512  }
  0x5c   : > { %522 = sst [smem:[#allocation9]] (%p746_p9), %s678_s4  ;;  %s679_s5 = smov 1024  }
  0x5d   : > { %523 = sst [smem:[#allocation9 + $0x1]] (%p746_p9), %s679_s5  ;;  %s680_s12 = smov 2  }
  0x5e   : > { %524 = sst [smem:[#allocation9 + $0x2]] (%p746_p9), %s680_s12  ;;  %s681_s13 = smov 256  }
  0x5f   : > { %525 = sst [smem:[#allocation9 + $0x3]] (%p746_p9), %s681_s13  ;;  %s682_s9 = smov 16  }
  0x60   : > { %526 = sst [smem:[#allocation9 + $0x4]] (%p746_p9), %s681_s13  ;;  %s683_s15 = smov [#allocation8]  }
  0x61   : > { %527 = sst [smem:[#allocation9 + $0x5]] (%p746_p9), %s682_s9  ;;  %s684_s17 = smov 0  }
  0x62   : > { %528 = dma.general (%p746_p9), %s377_s29, 1536, %s359_s3, %s344_s18, %s683_s15, [#allocation9], %s684_s17, 0  }
  0x63 PF: > { %s404_s23 = sand.u32 1, %s648_s6   ;;  %p531_p2 = pnand %p479_p12, %p753_p11 }
  0x64   : > { %s405_s24 = scalar_lea.sflag [#allocation4], %s404_s23 }
  0x65   : > { %643 = dma.done.wait (!%p531_p2), %s405_s24, 1536  }
  0x66   : > { %645 = vsyncadd (!%p531_p2), %s405_s24, 4294965760  ;;  %s17_s11 = sadd.s32 1, %s668_s11   ;;  %s1117_s6 = smov %s652_s7 }
  0x67   : > { %p14_p3 = scmp.ge.s32.totalorder %s17_s11, 4   ;;  %s1118_s7 = smov %s656_s8 }
  0x68   : > { %s1119_s8 = smov %s751_s20  ;;  %s1120_s9 = smov %s664_s10 }
  0x69   : > { %s1121_s10 = smov %s1123_s14  ;;  %16 = sbr.rel (!%p14_p3) target bundleno = 6 (0x6), region = 83 }
  0x70   :  { %410 = vsyncpa [#allocation3], 1 }
  0x71   :  { %412 = vsyncpa [#allocation3 + $0x1], 1 }
  0x72   :  { %413 = vsyncpa [#allocation4], 1 }
  0x73   :  { %415 = vsyncpa [#allocation4 + $0x1], 1 }

</bundles_post_ra>
